<compile_context>
chip_gen: v6e
topology: v6e:2x2x1
jax: 0.10.0
libtpu: 0.0.40
codegen_flags: <defaults>
</compile_context>

<pallas_src>
import functools

import jax
import jax.numpy as jnp
from jax.experimental import pallas as pl
from jax.experimental.pallas import tpu as pltpu

_VMEM_LIMIT = 32 * 1024 * 1024  # safe on v5e/v6e/v7x, above v5e's 16 MiB default


# ------------------------------ tiling helpers ------------------------------

def _pick_tile(dim, preferred):
    """Largest tile from `preferred` (descending) dividing `dim`, else aligned fallback."""
    if dim <= preferred[-1]:
        return dim
    for t in preferred:
        if dim % t == 0:
            return t
    for t in (512, 384, 256, 128, 64, 32, 16, 8):
        if t <= preferred[0] and dim % t == 0:
            return t
    # TODO(synk): pad/mask ragged last tiles instead of a full-dim fallback.
    return dim


# --------------------------- tiled matmul kernels ----------------------------

def _matmul_kernel(x_ref, w_ref, o_ref, acc_ref):
    @pl.when(pl.program_id(2) == 0)
    def _():
        acc_ref[...] = jnp.zeros_like(acc_ref)

    acc_ref[...] += jnp.dot(
        x_ref[...], w_ref[...], preferred_element_type=jnp.float32
    )

    @pl.when(pl.program_id(2) == pl.num_programs(2) - 1)
    def _():
        o_ref[...] = acc_ref[...].astype(o_ref.dtype)


def pallas_matmul(x, w, out_dtype=None):
    """x: (M, K) @ w: (K, N) -> (M, N); bf16 MXU inputs, f32 accumulation."""
    if out_dtype is None:
        out_dtype = x.dtype
    M, K = x.shape
    K2, N = w.shape
    assert K == K2
    tm = _pick_tile(M, (512, 256, 128))
    tn = _pick_tile(N, (512, 256, 128))
    tk = _pick_tile(K, (1024, 512, 256, 128))
    grid = (M // tm, N // tn, K // tk)
    return pl.pallas_call(
        _matmul_kernel,
        out_shape=jax.ShapeDtypeStruct((M, N), out_dtype),
        grid=grid,
        in_specs=[
            pl.BlockSpec((tm, tk), lambda i, j, k: (i, k)),
            pl.BlockSpec((tk, tn), lambda i, j, k: (k, j)),
        ],
        out_specs=pl.BlockSpec((tm, tn), lambda i, j, k: (i, j)),
        scratch_shapes=[pltpu.VMEM((tm, tn), jnp.float32)],
        compiler_params=pltpu.CompilerParams(
            dimension_semantics=("parallel", "parallel", "arbitrary"),
            vmem_limit_bytes=_VMEM_LIMIT,
        ),
    )(x, w)


def _kv_matmul_kernel(x_ref, wk_ref, wv_ref, ok_ref, ov_ref, acck_ref, accv_ref):
    @pl.when(pl.program_id(2) == 0)
    def _():
        acck_ref[...] = jnp.zeros_like(acck_ref)
        accv_ref[...] = jnp.zeros_like(accv_ref)

    x = x_ref[...]
    acck_ref[...] += jnp.dot(x, wk_ref[...], preferred_element_type=jnp.float32)
    accv_ref[...] += jnp.dot(x, wv_ref[...], preferred_element_type=jnp.float32)

    @pl.when(pl.program_id(2) == pl.num_programs(2) - 1)
    def _():
        ok_ref[...] = acck_ref[...].astype(ok_ref.dtype)
        ov_ref[...] = accv_ref[...].astype(ov_ref.dtype)


def pallas_kv_matmul(x, w_k, w_v, out_dtype=None):
    """Fused K and V projections: x read once, two outputs, no concat/slice glue."""
    if out_dtype is None:
        out_dtype = x.dtype
    M, K = x.shape
    _, N = w_k.shape
    assert w_v.shape == (K, N)
    tm = _pick_tile(M, (512, 256, 128))
    tn = _pick_tile(N, (512, 256, 128))
    tk = _pick_tile(K, (1024, 512, 256, 128))
    grid = (M // tm, N // tn, K // tk)
    return pl.pallas_call(
        _kv_matmul_kernel,
        out_shape=(
            jax.ShapeDtypeStruct((M, N), out_dtype),
            jax.ShapeDtypeStruct((M, N), out_dtype),
        ),
        grid=grid,
        in_specs=[
            pl.BlockSpec((tm, tk), lambda i, j, k: (i, k)),
            pl.BlockSpec((tk, tn), lambda i, j, k: (k, j)),
            pl.BlockSpec((tk, tn), lambda i, j, k: (k, j)),
        ],
        out_specs=(
            pl.BlockSpec((tm, tn), lambda i, j, k: (i, j)),
            pl.BlockSpec((tm, tn), lambda i, j, k: (i, j)),
        ),
        scratch_shapes=[
            pltpu.VMEM((tm, tn), jnp.float32),
            pltpu.VMEM((tm, tn), jnp.float32),
        ],
        compiler_params=pltpu.CompilerParams(
            dimension_semantics=("parallel", "parallel", "arbitrary"),
            vmem_limit_bytes=_VMEM_LIMIT,
        ),
    )(x, w_k, w_v)


# ---------------- flash attention (GQA, fused RoPE) kernel -------------------

def _flash_attn_kernel(q_ref, k_ref, v_ref, cos_q_ref, sin_q_ref,
                       cos_k_ref, sin_k_ref, *rest, mask_mode, scale):
    if mask_mode == "mask":
        mask_ref, o_ref, q_sc, m_sc, l_sc, acc_sc = rest
    else:
        o_ref, q_sc, m_sc, l_sc, acc_sc = rest

    tq, N, H = q_ref.shape
    tkv, Kh, _ = k_ref.shape
    G = N // Kh
    half = H // 2
    qi = pl.program_id(1)
    ki = pl.program_id(2)

    @pl.when(ki == 0)
    def _():
        # RoPE on the whole query tile (once per (b, qi)), cached in VMEM as bf16.
        qf = q_ref[...].astype(jnp.float32)                 # (tq, N, H)
        cos = cos_q_ref[...][:, None, :]                    # (tq, 1, half)
        sin = sin_q_ref[...][:, None, :]
        q1 = qf[..., :half]
        q2 = qf[..., half:]
        q_sc[...] = jnp.concatenate(
            [q1 * cos - q2 * sin, q2 * cos + q1 * sin], axis=-1
        ).astype(q_sc.dtype)
        m_sc[...] = jnp.full(m_sc.shape, -1e30, dtype=jnp.float32)
        l_sc[...] = jnp.zeros(l_sc.shape, dtype=jnp.float32)
        acc_sc[...] = jnp.zeros(acc_sc.shape, dtype=jnp.float32)

    def compute():
        # RoPE on the K tile (all kv heads at once), VPU work hidden under MXU.
        kf = k_ref[...].astype(jnp.float32)                 # (tkv, Kh, H)
        cos = cos_k_ref[...][:, None, :]
        sin = sin_k_ref[...][:, None, :]
        k1 = kf[..., :half]
        k2 = kf[..., half:]
        k_rot = jnp.concatenate(
            [k1 * cos - k2 * sin, k2 * cos + k1 * sin], axis=-1
        ).astype(q_sc.dtype)                                # (tkv, Kh, H) bf16
        v_all = v_ref[...]

        if mask_mode == "causal":
            t_idx = jax.lax.broadcasted_iota(jnp.int32, (tq, tkv), 0)
            s_idx = jax.lax.broadcasted_iota(jnp.int32, (tq, tkv), 1)
            keep2 = (ki * tkv + s_idx) <= (qi * tq + t_idx)
        elif mask_mode == "mask":
            keep2 = mask_ref[...] != 0                      # int8 -> bool, (tq, tkv)
        else:
            keep2 = None
        if keep2 is not None:
            keep = jnp.broadcast_to(
                keep2[:, None, :], (tq, G, tkv)
            ).reshape(tq * G, tkv)

        for kh in range(Kh):                                # static GQA-group loop
            qg = q_sc[:, kh * G:(kh + 1) * G, :].reshape(tq * G, H)
            kg = k_rot[:, kh, :]                            # (tkv, H)
            vg = v_all[:, kh, :]
            # QK^T without explicit transpose: contract the last dims.
            s = jax.lax.dot_general(
                qg, kg, (((1,), (1,)), ((), ())),
                preferred_element_type=jnp.float32,
            )                                               # (tq*G, tkv)
            if scale != 1.0:                                # scale=1.0 -> compiled out
                s = s * jnp.float32(scale)
            if keep2 is not None:
                s = jnp.where(keep, s, jnp.float32(-1e30))

            m_prev = m_sc[kh]
            m_new = jnp.maximum(m_prev, jnp.max(s, axis=-1, keepdims=True))
            alpha = jnp.exp(m_prev - m_new)
            p = jnp.exp(s - m_new)
            l_sc[kh] = alpha * l_sc[kh] + jnp.sum(p, axis=-1, keepdims=True)
            acc_sc[kh] = alpha * acc_sc[kh] + jax.lax.dot_general(
                p.astype(vg.dtype), vg, (((1,), (0,)), ((), ())),
                preferred_element_type=jnp.float32,
            )
            m_sc[kh] = m_new

    if mask_mode == "causal":
        # Skip fully-masked KV tiles (the clamped index_map avoids their DMA too).
        @pl.when(ki * tkv <= qi * tq + (tq - 1))
        def _():
            compute()
    else:
        compute()

    @pl.when(ki == pl.num_programs(2) - 1)
    def _():
        for kh in range(Kh):
            inv = pl.reciprocal(l_sc[kh], approx=True)      # EUP slot, ~free
            # Lane-dense (tq, G*H) slab store into the (B, T, N*H) output.
            o_ref[:, kh * G * H:(kh + 1) * G * H] = (
                (acc_sc[kh] * inv).reshape(tq, G * H).astype(o_ref.dtype)
            )


def pallas_flash_attention(q, k, v, cos_q, sin_q, cos_k, sin_k, mask=None,
                           *, is_causal=False, scale=1.0):
    """q: (B,T,N,H); k/v: (B,S,Kh,H); cos/sin: (B,L,H//2); mask: optional (B,T,S) int8.

    Returns (B, T, N*H) in q.dtype (head-major transposes fully eliminated).
    """
    B, T, N, H = q.shape
    _, S, Kh, _ = k.shape
    G = N // Kh
    half = H // 2

    tq = _pick_tile(T, (256, 128))
    # Keep K/V resident per batch row when the double-buffered tiles fit VMEM.
    kv_resident_bytes = 2 * 2 * S * Kh * H * k.dtype.itemsize
    if kv_resident_bytes <= 8 * 1024 * 1024:
        tkv = S
    else:
        tkv = _pick_tile(S, (512, 256, 128))
    nq, nk = T // tq, S // tkv

    if is_causal:
        mask_mode = "causal"
    elif mask is not None:
        mask_mode = "mask"
    else:
        mask_mode = "none"

    if mask_mode == "causal":
        def kv_idx(qi, ki):
            # Clamp so skipped (fully masked) steps reuse the resident block.
            return jnp.minimum(ki, (qi * tq + tq - 1) // tkv)
    else:
        def kv_idx(qi, ki):
            return ki

    in_specs = [
        pl.BlockSpec((None, tq, N, H), lambda b, qi, ki: (b, qi, 0, 0)),
        pl.BlockSpec((None, tkv, Kh, H), lambda b, qi, ki: (b, kv_idx(qi, ki), 0, 0)),
        pl.BlockSpec((None, tkv, Kh, H), lambda b, qi, ki: (b, kv_idx(qi, ki), 0, 0)),
        pl.BlockSpec((None, tq, half), lambda b, qi, ki: (b, qi, 0)),
        pl.BlockSpec((None, tq, half), lambda b, qi, ki: (b, qi, 0)),
        pl.BlockSpec((None, tkv, half), lambda b, qi, ki: (b, kv_idx(qi, ki), 0)),
        pl.BlockSpec((None, tkv, half), lambda b, qi, ki: (b, kv_idx(qi, ki), 0)),
    ]
    inputs = [q, k, v, cos_q, sin_q, cos_k, sin_k]
    if mask_mode == "mask":
        in_specs.append(pl.BlockSpec((None, tq, tkv), lambda b, qi, ki: (b, qi, ki)))
        inputs.append(mask)

    kernel = functools.partial(_flash_attn_kernel, mask_mode=mask_mode, scale=scale)

    return pl.pallas_call(
        kernel,
        out_shape=jax.ShapeDtypeStruct((B, T, N * H), q.dtype),
        grid=(B, nq, nk),
        in_specs=in_specs,
        out_specs=pl.BlockSpec((None, tq, N * H), lambda b, qi, ki: (b, qi, 0)),
        scratch_shapes=[
            pltpu.VMEM((tq, N, H), q.dtype),              # RoPE'd Q cache (bf16)
            pltpu.VMEM((Kh, G * tq, 1), jnp.float32),     # m (running max)
            pltpu.VMEM((Kh, G * tq, 1), jnp.float32),     # l (running denom)
            pltpu.VMEM((Kh, G * tq, H), jnp.float32),     # acc (unnormalized out)
        ],
        compiler_params=pltpu.CompilerParams(
            dimension_semantics=("parallel", "parallel", "arbitrary"),
            vmem_limit_bytes=_VMEM_LIMIT,
        ),
    )(*inputs)


# ------------------------------- JAX glue -----------------------------------

def rope_timescale(head_dim, min_timescale=1.0, max_timescale=10000.0):
    half = head_dim // 2
    fraction = 2.0 * jnp.arange(0, half, dtype=jnp.float32) / head_dim
    return (min_timescale * (max_timescale / min_timescale) ** fraction).astype(
        jnp.float32
    )


def rope_cos_sin(position, timescale):
    """position: (B, L) -> cos, sin of shape (B, L, H//2) in f32."""
    sinusoid = position.astype(jnp.float32)[:, :, None] / timescale
    return jnp.cos(sinusoid), jnp.sin(sinusoid)


def prepare_params(raw, compute_dtype=jnp.bfloat16):
    """One-time weight prep: bf16 cast + o_proj kernel flatten (done outside forward)."""
    N = raw["num_query_heads"]
    H = raw["head_dim"]
    out_dim = raw["w_o"].shape[-1]
    return {
        "num_query_heads": N,
        "num_kv_heads": raw["num_kv_heads"],
        "head_dim": H,
        "out_dim": out_dim,
        "compute_dtype": compute_dtype,
        "w_q": raw["w_q"].astype(compute_dtype),
        "w_k": raw["w_k"].astype(compute_dtype),
        "w_v": raw["w_v"].astype(compute_dtype),
        "w_o_flat": raw["w_o"].reshape(N * H, out_dim).astype(compute_dtype),
        "rope_timescale": raw["rope_timescale"],
    }


def attention_forward(params, Xq, Xkv, q_positions, kv_positions=None,
                      attn_mask=None, is_causal=False):
    """Mirrors Attention.forward (self-attn, cache=None)."""
    if kv_positions is None:
        kv_positions = q_positions
    original_dtype = Xq.dtype
    cdt = params["compute_dtype"]

    B, T, D = Xq.shape
    _, S, E = Xkv.shape
    N = params["num_query_heads"]
    Kh = params["num_kv_heads"]
    H = params["head_dim"]
    out_dim = params["out_dim"]
    ts = params["rope_timescale"]

    xq = Xq.reshape(B * T, D).astype(cdt)
    xkv = Xkv.reshape(B * S, E).astype(cdt)

    # --- Q projection (Pallas tiled matmul, bf16 MXU) ---
    q = pallas_matmul(xq, params["w_q"], out_dtype=cdt).reshape(B, T, N, H)

    # --- fused K+V projection: Xkv read once, two outputs, no concat/slice ---
    k_flat, v_flat = pallas_kv_matmul(xkv, params["w_k"], params["w_v"], out_dtype=cdt)
    k = k_flat.reshape(B, S, Kh, H)
    v = v_flat.reshape(B, S, Kh, H)

    # --- RoPE tables (tiny f32 tensors); rotation itself is fused in-kernel ---
    cos_q, sin_q = rope_cos_sin(q_positions, ts)
    cos_k, sin_k = rope_cos_sin(kv_positions, ts)

    mask = None
    if (not is_causal) and (attn_mask is not None):
        # boolean (B, 1, T, S), True = keep -> int8 (B, T, S), selected in-kernel
        mask = attn_mask[:, 0].astype(jnp.int8)

    attn = pallas_flash_attention(
        q, k, v, cos_q, sin_q, cos_k, sin_k, mask,
        is_causal=is_causal, scale=1.0,
    )  # (B, T, N*H), lane-dense, no head transposes

    # --- output projection over (N*H) -> out_dim (Pallas tiled matmul) ---
    out = pallas_matmul(
        attn.reshape(B * T, N * H), params["w_o_flat"], out_dtype=original_dtype
    )
    return out.reshape(B, T, out_dim)


# --------------------------- pure-JAX f32 reference --------------------------

def apply_rope_ref(x, position, timescale):
    sinusoid = position.astype(jnp.float32)[:, :, None, None] / timescale
    sin = jnp.sin(sinusoid)
    cos = jnp.cos(sinusoid)
    first, second = jnp.split(x.astype(jnp.float32), 2, axis=-1)
    return jnp.concatenate(
        [first * cos - second * sin, second * cos + first * sin], axis=-1
    )


def make_bias(B, T, S, attn_mask, is_causal, dtype=jnp.float32):
    neg = jnp.asarray(-1e9, dtype)
    if is_causal:
        i = jnp.arange(T)[:, None]
        j = jnp.arange(S)[None, :]
        bias = jnp.where(j <= i, 0.0, neg).astype(dtype)
        return jnp.broadcast_to(bias[None, None], (B, 1, T, S))
    if attn_mask is not None:
        return jnp.where(attn_mask, 0.0, neg).astype(dtype)
    return jnp.zeros((B, 1, T, S), dtype)


def reference_forward(params, Xq, Xkv, q_positions, kv_positions=None,
                      attn_mask=None, is_causal=False):
    if kv_positions is None:
        kv_positions = q_positions
    B, T, D = Xq.shape
    _, S, E = Xkv.shape
    N = params["num_query_heads"]
    Kh = params["num_kv_heads"]
    H = params["head_dim"]
    out_dim = params["w_o"].shape[-1]
    gqa = N // Kh
    ts = params["rope_timescale"]

    q = (Xq.reshape(B * T, D) @ params["w_q"]).reshape(B, T, N, H)
    k = (Xkv.reshape(B * S, E) @ params["w_k"]).reshape(B, S, Kh, H)
    v = (Xkv.reshape(B * S, E) @ params["w_v"]).reshape(B, S, Kh, H)
    q = apply_rope_ref(q, q_positions, ts)
    k = apply_rope_ref(k, kv_positions, ts)
    qh = jnp.transpose(q, (0, 2, 1, 3))
    kh = jnp.repeat(jnp.transpose(k, (0, 2, 1, 3)), gqa, axis=1)
    vh = jnp.repeat(jnp.transpose(v, (0, 2, 1, 3)), gqa, axis=1)
    bias = make_bias(B, T, S, attn_mask, is_causal)
    scores = jnp.einsum("bnth,bnsh->bnts", qh, kh) * 1.0 + bias
    p = jax.nn.softmax(scores, axis=-1)
    o = jnp.einsum("bnts,bnsh->bnth", p, vh)
    o = jnp.transpose(o, (0, 2, 1, 3)).reshape(B * T, N * H)
    return (o @ params["w_o"].reshape(N * H, out_dim)).reshape(B, T, out_dim)


# ---------------------------------- main -------------------------------------

if __name__ == "__main__":
    B, T, S = 2, 8, 8
    q_embed_dim = 32
    kv_embed_dim = 32
    num_query_heads = 4
    num_kv_heads = 2
    head_dim = 16
    out_embed_dim = 32
    dtype = jnp.float32

    key = jax.random.PRNGKey(0)
    k1, k2, k3, k4, k5, k6 = jax.random.split(key, 6)

    raw_params = {
        "num_query_heads": num_query_heads,
        "num_kv_heads": num_kv_heads,
        "head_dim": head_dim,
        # DenseGeneralOptimized weights: (in_features, heads*head_dim)
        "w_q": (jax.random.normal(k1, (q_embed_dim, num_query_heads * head_dim)) * 0.02).astype(dtype),
        "w_k": (jax.random.normal(k2, (kv_embed_dim, num_kv_heads * head_dim)) * 0.02).astype(dtype),
        "w_v": (jax.random.normal(k3, (kv_embed_dim, num_kv_heads * head_dim)) * 0.02).astype(dtype),
        # DenseGeneral o_proj kernel: (num_query_heads, head_dim, out_embed_dim)
        "w_o": (jax.random.normal(k4, (num_query_heads, head_dim, out_embed_dim)) * 0.02).astype(dtype),
        "rope_timescale": rope_timescale(head_dim, 1.0, 10000.0),
    }
    kparams = prepare_params(raw_params, compute_dtype=jnp.bfloat16)

    Xq = jax.random.normal(k5, (B, T, q_embed_dim), dtype=dtype)
    Xkv = jax.random.normal(k6, (B, S, kv_embed_dim), dtype=dtype)
    q_positions = jnp.broadcast_to(jnp.arange(T, dtype=jnp.int32)[None, :], (B, T))
    kv_positions = jnp.broadcast_to(jnp.arange(S, dtype=jnp.int32)[None, :], (B, S))

    def check(name, attn_mask, is_causal):
        out = attention_forward(
            kparams, Xq, Xkv, q_positions, kv_positions,
            attn_mask=attn_mask, is_causal=is_causal,
        )
        out = jax.block_until_ready(out)
        ref = reference_forward(
            raw_params, Xq, Xkv, q_positions, kv_positions,
            attn_mask=attn_mask, is_causal=is_causal,
        )
        assert out.shape == (B, T, out_embed_dim), (name, out.shape)
        err = float(jnp.max(jnp.abs(out - ref)))
        tol = 2e-3 + 2e-2 * float(jnp.max(jnp.abs(ref)))
        assert err < tol, f"{name}: max abs err {err} (tol {tol})"

    # 1) causal self-attention
    check("causal", attn_mask=None, is_causal=True)

    # 2) full (non-causal, no mask) self-attention
    check("full", attn_mask=None, is_causal=False)

    # 3) non-causal with a boolean key-padding mask (exercises the int8 mask path)
    valid_len = jnp.array([S, 5], dtype=jnp.int32)
    key_ok = jnp.arange(S, dtype=jnp.int32)[None, :] < valid_len[:, None]  # (B, S)
    attn_mask = jnp.broadcast_to(key_ok[:, None, None, :], (B, 1, T, S))
    check("masked", attn_mask=attn_mask, is_causal=False)

    print("KERNEL_OK")
</pallas_src>

<mosaic_0001>
module attributes {stable_mosaic.version = 11 : i64} {
  func.func @_matmul_kernel(%arg0: i32, %arg1: i32, %arg2: i32, %arg3: memref<16x32xbf16, #tpu.memory_space<vmem>>, %arg4: memref<32x64xbf16, #tpu.memory_space<vmem>>, %arg5: memref<16x64xbf16, #tpu.memory_space<vmem>>, %arg6: memref<16x64xf32, #tpu.memory_space<vmem>>) attributes {dimension_semantics = [#tpu.dimension_semantics<parallel>, #tpu.dimension_semantics<parallel>, #tpu.dimension_semantics<arbitrary>], iteration_bounds = array<i64: 1, 1, 1>, scalar_prefetch = 0 : i64, scratch_operands = 1 : i64, tpu.core_type = #tpu.core_type<tc>, window_params = [{transform_indices = @transform_0, window_bounds = array<i64: 16, 32>}, {transform_indices = @transform_1, window_bounds = array<i64: 32, 64>}, {transform_indices = @transform_2, window_bounds = array<i64: 16, 64>}]} {
    %c0_i32 = arith.constant 0 : i32
    %0 = arith.cmpi eq, %arg2, %c0_i32 : i32
    %1 = arith.extui %0 : i1 to i32
    %c0_i32_0 = arith.constant 0 : i32
    %2 = arith.cmpi ne, %1, %c0_i32_0 : i32
    scf.if %2 {
      %cst_10 = arith.constant 0.000000e+00 : f32
      %12 = vector.broadcast %cst_10 : f32 to vector<16x64xf32>
      %c0_11 = arith.constant 0 : index
      %c0_12 = arith.constant 0 : index
      %13 = vector.load %arg6[%c0_11, %c0_12] : memref<16x64xf32, #tpu.memory_space<vmem>>, vector<16x64xf32>
      tpu.vector_store %arg6[%c0_11, %c0_12], %12 {strides = array<i32>} : memref<16x64xf32, #tpu.memory_space<vmem>>, vector<16x64xf32>,
    } else {
    }
    %c0 = arith.constant 0 : index
    %c0_1 = arith.constant 0 : index
    %3 = vector.load %arg6[%c0, %c0_1] : memref<16x64xf32, #tpu.memory_space<vmem>>, vector<16x64xf32>
    %c0_2 = arith.constant 0 : index
    %c0_3 = arith.constant 0 : index
    %4 = vector.load %arg3[%c0_2, %c0_3] : memref<16x32xbf16, #tpu.memory_space<vmem>>, vector<16x32xbf16>
    %c0_4 = arith.constant 0 : index
    %c0_5 = arith.constant 0 : index
    %5 = vector.load %arg4[%c0_4, %c0_5] : memref<32x64xbf16, #tpu.memory_space<vmem>>, vector<32x64xbf16>
    %cst = arith.constant dense<0.000000e+00> : vector<16x64xf32>
    %6 = tpu.matmul %4, %5, %cst {dimension_numbers = #tpu.dot_dimension_numbers<[1], [0], [0], [1], [0, 0, 1, 1], [], []>} : vector<16x32xbf16>, vector<32x64xbf16>, vector<16x64xf32> -> vector<16x64xf32>
    %7 = arith.addf %3, %6 : vector<16x64xf32>
    %c0_6 = arith.constant 0 : index
    %c0_7 = arith.constant 0 : index
    %8 = vector.load %arg6[%c0_6, %c0_7] : memref<16x64xf32, #tpu.memory_space<vmem>>, vector<16x64xf32>
    tpu.vector_store %arg6[%c0_6, %c0_7], %7 {strides = array<i32>} : memref<16x64xf32, #tpu.memory_space<vmem>>, vector<16x64xf32>,
    %c0_i32_8 = arith.constant 0 : i32
    %9 = arith.cmpi eq, %arg2, %c0_i32_8 : i32
    %10 = arith.extui %9 : i1 to i32
    %c0_i32_9 = arith.constant 0 : i32
    %11 = arith.cmpi ne, %10, %c0_i32_9 : i32
    scf.if %11 {
      %c0_10 = arith.constant 0 : index
      %c0_11 = arith.constant 0 : index
      %12 = vector.load %arg6[%c0_10, %c0_11] : memref<16x64xf32, #tpu.memory_space<vmem>>, vector<16x64xf32>
      %13 = arith.truncf %12 : vector<16x64xf32> to vector<16x64xbf16>
      %c0_12 = arith.constant 0 : index
      %c0_13 = arith.constant 0 : index
      %14 = vector.load %arg5[%c0_12, %c0_13] : memref<16x64xbf16, #tpu.memory_space<vmem>>, vector<16x64xbf16>
      tpu.vector_store %arg5[%c0_12, %c0_13], %13 {strides = array<i32>} : memref<16x64xbf16, #tpu.memory_space<vmem>>, vector<16x64xbf16>,
    } else {
    }
    return
  }
  func.func @transform_0(%arg0: i32, %arg1: i32, %arg2: i32) -> (i32, i32) {
    %c0_i32 = arith.constant 0 : i32
    return %arg0, %arg2 : i32, i32
  }
  func.func @transform_1(%arg0: i32, %arg1: i32, %arg2: i32) -> (i32, i32) {
    %c0_i32 = arith.constant 0 : i32
    return %arg2, %arg1 : i32, i32
  }
  func.func @transform_2(%arg0: i32, %arg1: i32, %arg2: i32) -> (i32, i32) {
    %c0_i32 = arith.constant 0 : i32
    return %arg0, %arg1 : i32, i32
  }
}

</mosaic_0001>

<bundles_post_ra>
// kernel: tpu_custom_call.1
= control target key start
LH: loop header
LB: loop body
LE: loop exit
PB: predicated region body
PF: predicated region fallthrough
CT: control target
= control target key end

     0   :  { %7 = vsyncpa [#allocation4], 0  ;;  %s296_s0 = inlined_call_operand.hbm [shape: bf16[16,32], index: 0, kind: input, shape index: {}]   ;;  %s297_s1 = inlined_call_operand.hbm [shape: bf16[32,64], index: 1, kind: input, shape index: {}]   ;;  %s298_s2 = inlined_call_operand.hbm [shape: bf16[16,64], index: 2, kind: output, shape index: {}]  }
   0x1   :  { %8 = vsyncpa [#allocation7], 0 }
   0x2   :  { %9 = vsyncpa [#allocation5], 0  ;;  %s252_s9 = smov [#allocation3]  }
   0x3   :  { %s15_s10 = sshll.u32 %s252_s9, 4  ;;  %s16_s10 = int_to_ptr.vmem [resolvable:$true] %s15_s10 }
   0x4   :  { %s194_s11 = scalar_lea.vmem %s16_s10, 128  ;;  %p199_p1 = scmp.lt.s32.totalorder %s16_s10, %s16_s10 }
   0x5   :  { %p195_p0 = scmp.ne.s32.totalorder %s16_s10, %s194_s11  ;;  %p200_p2 = scmp.lt.s32.totalorder %s194_s11, %s194_s11 }
   0x7   :  { %p201_p3 = por %p200_p2, %p199_p1 }
   0x9   :  { %p202_p4 = pnand %p201_p3, %p195_p0 }
   0xb   :  { %205 = shalt.err (!%p202_p4)
}
   0xc   :  { %s253_s12 = smov 64   ;;  %s254_s13 = smov 4  }
   0xd   :  { %21 = dma.hbm_to_vmem [thread:$0]  %s296_s0, 128, %s16_s10, [#allocation4], %s253_s12, %s253_s12, %s254_s13  }
   0xe   :  { %s255_s16 = smov [#allocation6]  }
   0xf   :  { %s27_s17 = sshll.u32 %s255_s16, 4  ;;  %s28_s17 = int_to_ptr.vmem [resolvable:$true] %s27_s17 }
  0x10   :  { %s214_s18 = scalar_lea.vmem %s28_s17, 256  ;;  %p219_p6 = scmp.lt.s32.totalorder %s28_s17, %s28_s17 }
  0x11   :  { %p215_p5 = scmp.ne.s32.totalorder %s28_s17, %s214_s18  ;;  %p220_p7 = scmp.lt.s32.totalorder %s214_s18, %s214_s18 }
  0x13   :  { %p221_p8 = por %p220_p7, %p219_p6 }
  0x15   :  { %p222_p9 = pnand %p221_p8, %p215_p5 }
  0x17   :  { %225 = shalt.err (!%p222_p9)
}
  0x18   :  { %33 = dma.hbm_to_vmem [thread:$0]  %s297_s1, 256, %s28_s17, [#allocation7], %s253_s12, %s253_s12, %s254_s13  }
  0x19   :  { %246 = dma.done.wait [#allocation4], 128  }
  0x1a   :  { %247 = vsyncadd [#allocation4], 4294967168 }
  0x1b   :  { %248 = dma.done.wait [#allocation7], 256  }
  0x1c   :  { %249 = vsyncadd [#allocation7], 4294967040  ;;  %vm45_vm0 = vcmask 523264   ;;  %v256_v0 = vmov 0.0   ;;  %vm257_vm1 = vmmov 0   ;;  %v183_v1 = vld [vmem:[#allocation6 + $0x8] sm:$0xff]  }
  0x1d   :  { %46 = vst.msk [vmem:[#allocation2] sm:$0xff] %vm45_vm0, %v256_v0  ;;  %47 = vst.msk [vmem:[#allocation2 + $0x8] sm:$0xff] %vm45_vm0, %v256_v0  ;;  %168 = vmatprep.subr.bf16.mxu0 %v256_v0  ;;  %172 = vmatprep.mubr.msk.bf16.mxu0 %vm257_vm1, %v256_v0  ;;  %v184_v2 = vld [vmem:[#allocation6] sm:$0xff]   ;;  %v185_v3 = vld [vmem:[#allocation3] sm:$0xff]   ;;  %vm73_vm2 = vcmask 261120   ;;  %vm136_vm3 = vcmask 519168  }
  0x1e   :  { %169 = vmatpush3.bf16.msra.mxu0 %v183_v1  ;;  %s258_s0 = smov [#allocation8]  }
  0x1f   :  { %170 = vmatprep.subr.bf16.mxu0 %v256_v0  ;;  %s144_s1 = sshll.u32 %s258_s0, 4  ;;  %s145_s1 = int_to_ptr.vmem [resolvable:$true] %s144_s1 }
  0x20   :  { %s226_s21 = scalar_lea.vmem %s145_s1, 128  ;;  %p231_p11 = scmp.lt.s32.totalorder %s145_s1, %s145_s1 }
  0x21   :  { %p227_p10 = scmp.ne.s32.totalorder %s145_s1, %s226_s21  ;;  %p232_p12 = scmp.lt.s32.totalorder %s226_s21, %s226_s21 }
  0x22   :  { %171 = vmatpush3.bf16.msra.mxu0 %v184_v2 }
  0x23   :  { %p233_p13 = por %p232_p12, %p231_p11 }
  0x24   :  { %v48_v4 = vld [vmem:[#allocation2] sm:$0xff]  ;;  %v49_v8 = vld [vmem:[#allocation2 + $0x8] sm:$0xff] }
  0x25   :  { %173 = vmatmul.mubr.msk.bf16.vlgmr.msra.gmra.mxu0 %vm73_vm2, %v185_v3  ;;  %p234_p0 = pnand %p233_p13, %p227_p10 }
  0xe5   :  { %v111_v5 = vpop.f32.mrf.mxu0 }
  0xe6   :  { %v118_v6 = vadd.f32 %v111_v5, %v48_v4 }
  0xe7   :  { %v174_v7 = vpop.f32.mrf.mxu0 }
  0xe8   :  { %121 = vst.msk [vmem:[#allocation2] sm:$0xff] %vm45_vm0, %v118_v6 }
  0xe9   :  { %v114_v9 = vpop.f32.mrf.mxu0 }
  0xea   :  { %v119_v10 = vadd.f32 %v114_v9, %v49_v8 }
  0xeb   :  { %v175_v11 = vpop.f32.mrf.mxu0 }
  0xec   :  { %122 = vst.msk [vmem:[#allocation2 + $0x8] sm:$0xff] %vm45_vm0, %v119_v10 }
  0xef   :  { %v126_v12 = vld [vmem:[#allocation2] sm:$0xff] }
  0xf0   :  { %v163_v13 = vpack.c.bf16 %v126_v12, %v126_v12 }
  0xf2   :  { %137 = vst.msk [vmem:[#allocation8] sm:$0xf] %vm136_vm3, %v163_v13 }
  0xf3   :  { %v127_v14 = vld [vmem:[#allocation2 + $0x8] sm:$0xff] }
  0xf4   :  { %v164_v15 = vpack.c.bf16 %v127_v14, %v127_v14 }
  0xf6   :  { %138 = vst.msk [vmem:[#allocation8 + $0x4] sm:$0xf] %vm136_vm3, %v164_v15 }
  0xf7   :  { %237 = shalt.err (!%p234_p0)
}
  0xf8   :  { %150 = dma.vmem_to_hbm [thread:$0]  %s145_s1, 128, %s298_s2, [#allocation5], %s253_s12, %s253_s12, %s254_s13  }
  0xf9   :  { %250 = dma.done.wait [#allocation5], 128  }
  0xfa   :  { %251 = vsyncadd [#allocation5], 4294967168 }
  0xfb   :  { %154 = vsyncpa [#allocation4], 1 }
  0xfc   :  { %155 = vsyncpa [#allocation7], 1 }
  0xfd   :  { %156 = vsyncpa [#allocation5], 1 }

</bundles_post_ra>
